<compile_context>
chip_gen: v7x
topology: tpu7x:2x2x1
jax: 0.10.0
libtpu: 0.0.40
codegen_flags: <defaults>
</compile_context>

<pallas_src>
import numpy as np
import jax
import jax.numpy as jnp
from jax import lax
from jax.experimental import pallas as pl
from jax.experimental.pallas import tpu as pltpu

# ---------------- synthetic hyperparameters (the globals the module references) ---------
WORD_VOCAB      = 50          # len(word_vocab)
DIST_VOCAB      = 20          # dist_vocab_size
WORD_EMBED_DIM  = 16          # word_embed_dim
DIST_EMBED_DIM  = 8           # distance_embed_dim
INPUT_DIM       = WORD_EMBED_DIM + 2 * DIST_EMBED_DIM      # 32
ATTN_DIM        = INPUT_DIM + WORD_EMBED_DIM               # 48
NUM_FILTER      = 32          # conv_filter_cnt
CLASS_COUNT     = 5           # len(relation_cls_label_map)
B, T            = 2, 8        # batch, seq length

NEG_BIG = 1e30
OUT_PAD = 128                 # lane-dense padded logits width

# ---- one-hot (K axis) layout of the fused gather+project matmul ------------------------
W_OFF    = 0                                   # word index  -> cols   0: 50
D1_OFF   = WORD_VOCAB                          # dist1 index -> cols  50: 70
D2_OFF   = D1_OFF + DIST_VOCAB                 # dist2 index -> cols  70: 90
ARG1_OFF = D2_OFF + DIST_VOCAB                 # arg1 index  -> cols  90:140
ARG2_OFF = ARG1_OFF + WORD_VOCAB               # arg2 index  -> cols 140:190
KPAD     = 192                                 # padded contraction dim

# ---- column (N axis) layout of W_full ---------------------------------------------------
ATT_OFF     = 0                                # 0:48 head1, 48:96 head2, 96:128 zero pad
CONV_OFF    = 128                              # 128:160 tap x[t-1], 160:192 x[t], 192:224 x[t+1]
XID_OFF     = 224                              # 224:256 identity -> raw concatenated x
WFULL_WIDTH = 256

# ---- misc slab rows (all multiples of 16 => bf16-sublane-tile aligned slices) -----------
R_ROW     = 0                                  # row 0: r1 (cols 0:48), row 1: r2 (cols 48:96)
CONVB_ROW = 16                                 # conv bias (cols 0:NUM_FILTER)
WD_ROW    = 32                                 # dense weight rows 32:128 (cols >= CLASS_COUNT zero)
BD_ROW    = WD_ROW + NUM_FILTER + 2 * INPUT_DIM   # 128: dense bias
MISC_ROWS = 144


# ------------------------------------ Pallas kernel -------------------------------------
def ea_kernel(widx_ref, d1idx_ref, d2idx_ref, aidx_ref, mask_ref, wfull_ref, misc_ref,
              out_ref):
    B_, T_ = widx_ref.shape
    BT = B_ * T_
    F_ = NUM_FILTER
    D_ = INPUT_DIM
    mask3 = mask_ref[...]                                   # (B, T, 1) f32, 1=real 0=pad

    # ---- build the fused one-hot (gathers word/dist1/dist2 + arg1/arg2 broadcast over T)
    col = lax.broadcasted_iota(jnp.int32, (B_, T_, KPAD), 2)
    w3  = widx_ref[...][:, :, None]                         # (B, T, 1)
    d13 = d1idx_ref[...][:, :, None] + D1_OFF
    d23 = d2idx_ref[...][:, :, None] + D2_OFF
    a_all = aidx_ref[...]                                   # (B, 2) int32
    a13 = a_all[:, 0:1][:, :, None] + ARG1_OFF              # (B, 1, 1) broadcast over T
    a23 = a_all[:, 1:2][:, :, None] + ARG2_OFF
    onehot = ((col == w3) | (col == d13) | (col == d23) | (col == a13) | (col == a23))
    onehot = onehot.astype(jnp.float32).reshape(BT, KPAD).astype(jnp.bfloat16)

    # ---- single MXU pass: all embedding gathers + conv taps + attention x&arg proj + raw x
    m_all = jnp.dot(onehot, wfull_ref[...],
                    preferred_element_type=jnp.float32)     # (B*T, 256) f32 accumulation

    x3 = m_all[:, XID_OFF:XID_OFF + D_].reshape(B_, T_, D_)  # raw concat embeddings "input"

    # ---- CNN_Layer: (mask*x) conv(k=3,pad=1) -> max over time -> tanh --------------------
    # mask multiplies rows, so it commutes with the matmul: applied ONCE to the 96-wide slab.
    conv_slab = m_all[:, CONV_OFF:CONV_OFF + 3 * F_].reshape(B_, T_, 3 * F_) * mask3
    m0 = conv_slab[:, :, 0:F_]                               # tap uses x[t-1]
    m1 = conv_slab[:, :, F_:2 * F_]                          # tap uses x[t]
    m2 = conv_slab[:, :, 2 * F_:3 * F_]                      # tap uses x[t+1]
    t_col = lax.broadcasted_iota(jnp.int32, (T_, 1), 0)
    e_lo = (t_col >= 1).astype(jnp.float32)[None]            # zero wrapped row at t == 0
    e_hi = (t_col <= T_ - 2).astype(jnp.float32)[None]       # zero wrapped row at t == T-1
    conv = (pltpu.roll(m0, shift=1, axis=1) * e_lo
            + m1
            + pltpu.roll(m2, shift=T_ - 1, axis=1) * e_hi)   # (B, T, F)
    conv_b = misc_ref[CONVB_ROW:CONVB_ROW + 1, 0:F_]         # (1, F) bf16 -> promotes to f32
    # bias is constant over time, so it can be added after the max (equivalent).
    cnn_out = jnp.tanh(jnp.max(conv, axis=1) + conv_b)       # (B, F) f32

    # ---- both attention heads (arg projection already fused into m_all cols 0:128) ------
    th = jnp.tanh(m_all[:, ATT_OFF:ATT_OFF + 128])           # (B*T, 128) f32
    r8 = misc_ref[R_ROW:R_ROW + 8, :]                        # (8, 128) bf16, rows 0/1 = r1/r2
    scores = lax.dot_general(th.astype(jnp.bfloat16), r8,
                             (((1,), (1,)), ((), ())),
                             preferred_element_type=jnp.float32).reshape(B_, T_, 8)
    s = scores + (mask3 - 1.0) * NEG_BIG                     # additive mask (= masked_fill -inf)
    s = s - jnp.max(s, axis=1, keepdims=True)
    e = jnp.exp(s)
    p = e * pl.reciprocal(jnp.sum(e, axis=1, keepdims=True), approx=True)   # softmax over T
    v1 = jnp.sum(p[:, :, 0:1] * x3, axis=1)                  # (B, D)  bmm with "input"
    v2 = jnp.sum(p[:, :, 1:2] * x3, axis=1)                  # (B, D)

    # ---- final dense over [cnn_out ; v1 ; v2]: single matmul into a lane-dense tile -----
    feat = jnp.concatenate([cnn_out, v1, v2], axis=-1).astype(jnp.bfloat16)   # (B, 96)
    wd = misc_ref[WD_ROW:WD_ROW + F_ + 2 * D_, :]            # (96, 128) bf16
    bd = misc_ref[BD_ROW:BD_ROW + 1, :]                      # (1, 128)  bf16
    out_ref[...] = jnp.dot(feat, wd, preferred_element_type=jnp.float32) + bd


# ------------------------------------ host-side weight packing ---------------------------
def pack_params(p):
    We, De = WORD_EMBED_DIM, DIST_EMBED_DIM
    D, F, H, C = INPUT_DIM, NUM_FILTER, ATTN_DIM, CLASS_COUNT
    word = np.asarray(p['word_emb'], np.float32)
    d1e = np.asarray(p['dist1_emb'], np.float32)
    d2e = np.asarray(p['dist2_emb'], np.float32)

    # per-x-dim projection slab: attention x-proj | conv taps | identity (raw-x passthrough)
    wx = np.zeros((D, WFULL_WIDTH), np.float32)
    wx[:, ATT_OFF:ATT_OFF + H]                 = np.asarray(p['a1_x'])
    wx[:, ATT_OFF + H:ATT_OFF + 2 * H]         = np.asarray(p['a2_x'])
    wx[:, CONV_OFF:CONV_OFF + F]               = np.asarray(p['conv_w'][0])   # x[t-1]
    wx[:, CONV_OFF + F:CONV_OFF + 2 * F]       = np.asarray(p['conv_w'][1])   # x[t]
    wx[:, CONV_OFF + 2 * F:CONV_OFF + 3 * F]   = np.asarray(p['conv_w'][2])   # x[t+1]
    wx[:, XID_OFF:XID_OFF + D]                 = np.eye(D, dtype=np.float32)

    # block-diagonal embedding table for the word/dist1/dist2 part of the one-hot
    E = np.zeros((ARG1_OFF, D), np.float32)                          # (90, 32)
    E[W_OFF:W_OFF + WORD_VOCAB, 0:We]               = word
    E[D1_OFF:D1_OFF + DIST_VOCAB, We:We + De]       = d1e
    E[D2_OFF:D2_OFF + DIST_VOCAB, We + De:We + 2 * De] = d2e

    # W_full = (gather ∘ project) composed host-side + arg-projection rows
    wfull = np.zeros((KPAD, WFULL_WIDTH), np.float32)
    wfull[0:ARG1_OFF, :] = E @ wx
    wfull[ARG1_OFF:ARG1_OFF + WORD_VOCAB, ATT_OFF:ATT_OFF + H]       = word @ np.asarray(p['a1_arg'])
    wfull[ARG2_OFF:ARG2_OFF + WORD_VOCAB, ATT_OFF + H:ATT_OFF + 2 * H] = word @ np.asarray(p['a2_arg'])

    misc = np.zeros((MISC_ROWS, OUT_PAD), np.float32)
    misc[R_ROW,     0:H]     = np.asarray(p['r1'][0])
    misc[R_ROW + 1, H:2 * H] = np.asarray(p['r2'][0])
    misc[CONVB_ROW, 0:F]     = np.asarray(p['conv_b'][0])
    misc[WD_ROW          :WD_ROW + F,          0:C] = np.asarray(p['wd_cnn'])
    misc[WD_ROW + F      :WD_ROW + F + D,      0:C] = np.asarray(p['wd_v1'])
    misc[WD_ROW + F + D  :WD_ROW + F + 2 * D,  0:C] = np.asarray(p['wd_v2'])
    misc[BD_ROW, 0:C]        = np.asarray(p['bd'][0])

    # bf16 slabs halve weight DMA; every in-kernel dot accumulates in f32.
    return jnp.asarray(wfull, jnp.bfloat16), jnp.asarray(misc, jnp.bfloat16)


# ------------------------------------ wrappers -------------------------------------------
@jax.jit
def ea_forward_pallas(wfull, misc, words_seq, words_mask, d1_seq, d2_seq, arg1, arg2):
    Bb = words_seq.shape[0]
    mask3 = words_mask.astype(jnp.float32)[:, :, None]                  # (B, T, 1)
    aidx = jnp.stack([arg1, arg2], axis=-1).astype(jnp.int32)           # (B, 2)
    vmem = pl.BlockSpec(memory_space=pltpu.MemorySpace.VMEM)   # whole-array blocks in VMEM
    out = pl.pallas_call(
        ea_kernel,
        out_shape=jax.ShapeDtypeStruct((Bb, OUT_PAD), jnp.float32),
        in_specs=[vmem] * 7,
        out_specs=vmem,
    )(words_seq.astype(jnp.int32), d1_seq.astype(jnp.int32), d2_seq.astype(jnp.int32),
      aidx, mask3, wfull, misc)
    return out[:, :CLASS_COUNT]                                # drop lane padding


def ea_forward(packed, words_seq, words_mask, words_arg1_dist_seq, words_arg2_dist_seq,
               piece1_mask, piece2_mask, piece3_mask, arg1, arg2, is_training=False):
    # piece*_mask accepted for signature parity with the PyTorch module but unused
    # (the reference forward never reads them).  Dropout is identity (eval).
    del piece1_mask, piece2_mask, piece3_mask, is_training
    wfull, misc = packed
    return ea_forward_pallas(wfull, misc, words_seq, words_mask,
                             words_arg1_dist_seq, words_arg2_dist_seq, arg1, arg2)


# ---------------------------- pure-JAX reference (for checking) --------------------------
def ea_reference(x, a1e, a2e, mask, p):
    xm = x * mask[:, :, None]
    m0 = jnp.einsum('btd,df->btf', xm, p['conv_w'][0])
    m1 = jnp.einsum('btd,df->btf', xm, p['conv_w'][1])
    m2 = jnp.einsum('btd,df->btf', xm, p['conv_w'][2])
    z = jnp.zeros((x.shape[0], 1, m0.shape[-1]), jnp.float32)
    conv = (jnp.concatenate([z, m0[:, :-1]], axis=1) + m1
            + jnp.concatenate([m2[:, 1:], z], axis=1) + p['conv_b'][:, None, :])
    cnn_out = jnp.tanh(jnp.max(conv, axis=1))

    def attend(arg_e, ax, aa, r):
        pre = jnp.einsum('btd,dh->bth', x, ax) + jnp.dot(arg_e, aa)[:, None, :]
        s = jnp.sum(jnp.tanh(pre) * r[None, :, :], axis=-1)
        s = jnp.where(mask > 0.0, s, -NEG_BIG)
        p_ = jax.nn.softmax(s, axis=-1)
        return jnp.einsum('bt,btd->bd', p_, x)

    v1 = attend(a1e, p['a1_x'], p['a1_arg'], p['r1'])
    v2 = attend(a2e, p['a2_x'], p['a2_arg'], p['r2'])
    return (cnn_out @ p['wd_cnn'] + v1 @ p['wd_v1'] + v2 @ p['wd_v2'] + p['bd'])


# ------------------------------------ param init -----------------------------------------
def init_params(key):
    ks = jax.random.split(key, 15)
    nrm = lambda k, s: 0.1 * jax.random.normal(k, s, dtype=jnp.float32)
    word_emb = nrm(ks[0], (WORD_VOCAB, WORD_EMBED_DIM)).at[0].set(0.0)    # padding_idx=0
    dist1_emb = nrm(ks[1], (DIST_VOCAB, DIST_EMBED_DIM)).at[0].set(0.0)
    dist2_emb = nrm(ks[2], (DIST_VOCAB, DIST_EMBED_DIM)).at[0].set(0.0)
    return dict(
        word_emb=word_emb, dist1_emb=dist1_emb, dist2_emb=dist2_emb,
        conv_w=nrm(ks[3], (3, INPUT_DIM, NUM_FILTER)),     # taps: x[t-1], x[t], x[t+1]
        conv_b=nrm(ks[4], (1, NUM_FILTER)),
        a1_x=nrm(ks[5], (INPUT_DIM, ATTN_DIM)),            # ent1_attn_a split: input rows
        a1_arg=nrm(ks[6], (WORD_EMBED_DIM, ATTN_DIM)),     #                  : arg rows
        r1=nrm(ks[7], (1, ATTN_DIM)),                      # ent1_attn_r
        a2_x=nrm(ks[8], (INPUT_DIM, ATTN_DIM)),
        a2_arg=nrm(ks[9], (WORD_EMBED_DIM, ATTN_DIM)),
        r2=nrm(ks[10], (1, ATTN_DIM)),
        wd_cnn=nrm(ks[11], (NUM_FILTER, CLASS_COUNT)),     # dense weight split into 3 blocks
        wd_v1=nrm(ks[12], (INPUT_DIM, CLASS_COUNT)),
        wd_v2=nrm(ks[13], (INPUT_DIM, CLASS_COUNT)),
        bd=nrm(ks[14], (1, CLASS_COUNT)),
    )


# ------------------------------------ main ------------------------------------------------
if __name__ == "__main__":
    key = jax.random.PRNGKey(0)
    kp, k1, k2, k3, k4, k5 = jax.random.split(key, 6)
    params = init_params(kp)
    packed = pack_params(params)          # host-side one-time packing into 2 bf16 slabs

    words_seq = jax.random.randint(k1, (B, T), 1, WORD_VOCAB)
    d1_seq = jax.random.randint(k2, (B, T), 1, DIST_VOCAB)
    d2_seq = jax.random.randint(k3, (B, T), 1, DIST_VOCAB)
    arg1 = jax.random.randint(k4, (B,), 1, WORD_VOCAB)
    arg2 = jax.random.randint(k5, (B,), 1, WORD_VOCAB)
    lengths = jnp.array([T, 5])
    words_mask = (jnp.arange(T)[None, :] < lengths[:, None]).astype(jnp.float32)
    piece_mask = jnp.ones((B, T), jnp.float32)   # unused by forward, signature parity only

    out = ea_forward(packed, words_seq, words_mask, d1_seq, d2_seq,
                     piece_mask, piece_mask, piece_mask, arg1, arg2)
    out = jax.block_until_ready(out)

    # cross-check against pure-JAX f32 reference (built from the UN-packed parameters)
    word_e = params['word_emb'][words_seq]
    x = jnp.concatenate([word_e, params['dist1_emb'][d1_seq], params['dist2_emb'][d2_seq]],
                        axis=2).astype(jnp.float32)
    ref = ea_reference(x, params['word_emb'][arg1], params['word_emb'][arg2],
                       words_mask, params)
    np.testing.assert_allclose(np.asarray(out), np.asarray(ref), rtol=2e-2, atol=2e-2)

    print("KERNEL_OK")
</pallas_src>

<mosaic_0001>
module attributes {stable_mosaic.version = 11 : i64} {
  func.func @ea_kernel(%arg0: memref<2x8xi32, #tpu.memory_space<vmem>>, %arg1: memref<2x8xi32, #tpu.memory_space<vmem>>, %arg2: memref<2x8xi32, #tpu.memory_space<vmem>>, %arg3: memref<2x2xi32, #tpu.memory_space<vmem>>, %arg4: memref<2x8x1xf32, #tpu.memory_space<vmem>>, %arg5: memref<192x256xbf16, #tpu.memory_space<vmem>>, %arg6: memref<144x128xbf16, #tpu.memory_space<vmem>>, %arg7: memref<2x128xf32, #tpu.memory_space<vmem>>) attributes {dimension_semantics = [], scalar_prefetch = 0 : i64, scratch_operands = 0 : i64, tpu.core_type = #tpu.core_type<tc>} {
    %c0 = arith.constant 0 : index
    %c0_0 = arith.constant 0 : index
    %c0_1 = arith.constant 0 : index
    %0 = vector.load %arg4[%c0, %c0_0, %c0_1] : memref<2x8x1xf32, #tpu.memory_space<vmem>>, vector<2x8x1xf32>
    %1 = tpu.iota {dimensions = array<i32: 2>} : vector<2x8x192xi32>
    %c0_2 = arith.constant 0 : index
    %c0_3 = arith.constant 0 : index
    %2 = vector.load %arg0[%c0_2, %c0_3] : memref<2x8xi32, #tpu.memory_space<vmem>>, vector<2x8xi32>
    %3 = vector.shape_cast %2 : vector<2x8xi32> to vector<2x8x1xi32>
    %c0_4 = arith.constant 0 : index
    %c0_5 = arith.constant 0 : index
    %4 = vector.load %arg1[%c0_4, %c0_5] : memref<2x8xi32, #tpu.memory_space<vmem>>, vector<2x8xi32>
    %5 = vector.shape_cast %4 : vector<2x8xi32> to vector<2x8x1xi32>
    %c50_i32 = arith.constant 50 : i32
    %6 = vector.broadcast %c50_i32 : i32 to vector<2x8x1xi32>
    %7 = arith.addi %5, %6 : vector<2x8x1xi32>
    %c0_6 = arith.constant 0 : index
    %c0_7 = arith.constant 0 : index
    %8 = vector.load %arg2[%c0_6, %c0_7] : memref<2x8xi32, #tpu.memory_space<vmem>>, vector<2x8xi32>
    %9 = vector.shape_cast %8 : vector<2x8xi32> to vector<2x8x1xi32>
    %c70_i32 = arith.constant 70 : i32
    %10 = vector.broadcast %c70_i32 : i32 to vector<2x8x1xi32>
    %11 = arith.addi %9, %10 : vector<2x8x1xi32>
    %c0_8 = arith.constant 0 : index
    %c0_9 = arith.constant 0 : index
    %12 = vector.load %arg3[%c0_8, %c0_9] : memref<2x2xi32, #tpu.memory_space<vmem>>, vector<2x2xi32>
    %13 = vector.extract_strided_slice %12 {offsets = [0, 0], sizes = [2, 1], strides = [1, 1]} : vector<2x2xi32> to vector<2x1xi32>
    %14 = vector.shape_cast %13 : vector<2x1xi32> to vector<2x1x1xi32>
    %c90_i32 = arith.constant 90 : i32
    %15 = vector.broadcast %c90_i32 : i32 to vector<2x1x1xi32>
    %16 = arith.addi %14, %15 : vector<2x1x1xi32>
    %17 = vector.extract_strided_slice %12 {offsets = [0, 1], sizes = [2, 1], strides = [1, 1]} : vector<2x2xi32> to vector<2x1xi32>
    %18 = vector.shape_cast %17 : vector<2x1xi32> to vector<2x1x1xi32>
    %c140_i32 = arith.constant 140 : i32
    %19 = vector.broadcast %c140_i32 : i32 to vector<2x1x1xi32>
    %20 = arith.addi %18, %19 : vector<2x1x1xi32>
    %21 = vector.broadcast %3 : vector<2x8x1xi32> to vector<2x8x192xi32>
    %22 = arith.cmpi eq, %1, %21 : vector<2x8x192xi32>
    %23 = vector.broadcast %7 : vector<2x8x1xi32> to vector<2x8x192xi32>
    %24 = arith.cmpi eq, %1, %23 : vector<2x8x192xi32>
    %25 = arith.ori %22, %24 : vector<2x8x192xi1>
    %26 = vector.broadcast %11 : vector<2x8x1xi32> to vector<2x8x192xi32>
    %27 = arith.cmpi eq, %1, %26 : vector<2x8x192xi32>
    %28 = arith.ori %25, %27 : vector<2x8x192xi1>
    %29 = vector.broadcast %16 : vector<2x1x1xi32> to vector<2x8x192xi32>
    %30 = arith.cmpi eq, %1, %29 : vector<2x8x192xi32>
    %31 = arith.ori %28, %30 : vector<2x8x192xi1>
    %32 = vector.broadcast %20 : vector<2x1x1xi32> to vector<2x8x192xi32>
    %33 = arith.cmpi eq, %1, %32 : vector<2x8x192xi32>
    %34 = arith.ori %31, %33 : vector<2x8x192xi1>
    %35 = arith.extui %34 : vector<2x8x192xi1> to vector<2x8x192xi32>
    %36 = arith.sitofp %35 : vector<2x8x192xi32> to vector<2x8x192xf32>
    %37 = vector.shape_cast %36 : vector<2x8x192xf32> to vector<16x192xf32>
    %38 = arith.truncf %37 : vector<16x192xf32> to vector<16x192xbf16>
    %c0_10 = arith.constant 0 : index
    %c0_11 = arith.constant 0 : index
    %39 = vector.load %arg5[%c0_10, %c0_11] : memref<192x256xbf16, #tpu.memory_space<vmem>>, vector<192x256xbf16>
    %cst = arith.constant dense<0.000000e+00> : vector<16x256xf32>
    %40 = tpu.matmul %38, %39, %cst {dimension_numbers = #tpu.dot_dimension_numbers<[1], [0], [0], [1], [0, 0, 1, 1], [], []>} : vector<16x192xbf16>, vector<192x256xbf16>, vector<16x256xf32> -> vector<16x256xf32>
    %41 = vector.extract_strided_slice %40 {offsets = [0, 224], sizes = [16, 32], strides = [1, 1]} : vector<16x256xf32> to vector<16x32xf32>
    %42 = vector.shape_cast %41 : vector<16x32xf32> to vector<2x8x32xf32>
    %43 = vector.extract_strided_slice %40 {offsets = [0, 128], sizes = [16, 96], strides = [1, 1]} : vector<16x256xf32> to vector<16x96xf32>
    %44 = vector.shape_cast %43 : vector<16x96xf32> to vector<2x8x96xf32>
    %45 = vector.broadcast %0 : vector<2x8x1xf32> to vector<2x8x96xf32>
    %46 = arith.mulf %44, %45 : vector<2x8x96xf32>
    %47 = vector.extract_strided_slice %46 {offsets = [0, 0, 0], sizes = [2, 8, 32], strides = [1, 1, 1]} : vector<2x8x96xf32> to vector<2x8x32xf32>
    %48 = vector.extract_strided_slice %46 {offsets = [0, 0, 32], sizes = [2, 8, 32], strides = [1, 1, 1]} : vector<2x8x96xf32> to vector<2x8x32xf32>
    %49 = vector.extract_strided_slice %46 {offsets = [0, 0, 64], sizes = [2, 8, 32], strides = [1, 1, 1]} : vector<2x8x96xf32> to vector<2x8x32xf32>
    %50 = tpu.iota {dimensions = array<i32: 0>} : vector<8x1xi32>
    %c1_i32 = arith.constant 1 : i32
    %51 = vector.broadcast %c1_i32 : i32 to vector<8x1xi32>
    %52 = arith.cmpi sge, %50, %51 : vector<8x1xi32>
    %53 = arith.extui %52 : vector<8x1xi1> to vector<8x1xi32>
    %54 = arith.sitofp %53 : vector<8x1xi32> to vector<8x1xf32>
    %55 = vector.shape_cast %54 : vector<8x1xf32> to vector<1x8x1xf32>
    %c6_i32 = arith.constant 6 : i32
    %56 = vector.broadcast %c6_i32 : i32 to vector<8x1xi32>
    %57 = arith.cmpi sle, %50, %56 : vector<8x1xi32>
    %58 = arith.extui %57 : vector<8x1xi1> to vector<8x1xi32>
    %59 = arith.sitofp %58 : vector<8x1xi32> to vector<8x1xf32>
    %60 = vector.shape_cast %59 : vector<8x1xf32> to vector<1x8x1xf32>
    %c1_i32_12 = arith.constant 1 : i32
    %61 = tpu.dynamic_rotate %47 by %c1_i32_12 dim 1 : vector<2x8x32xf32>, i32 -> vector<2x8x32xf32>
    %62 = vector.broadcast %55 : vector<1x8x1xf32> to vector<2x8x32xf32>
    %63 = arith.mulf %61, %62 : vector<2x8x32xf32>
    %64 = arith.addf %63, %48 : vector<2x8x32xf32>
    %c7_i32 = arith.constant 7 : i32
    %65 = tpu.dynamic_rotate %49 by %c7_i32 dim 1 : vector<2x8x32xf32>, i32 -> vector<2x8x32xf32>
    %66 = vector.broadcast %60 : vector<1x8x1xf32> to vector<2x8x32xf32>
    %67 = arith.mulf %65, %66 : vector<2x8x32xf32>
    %68 = arith.addf %64, %67 : vector<2x8x32xf32>
    %c16 = arith.constant 16 : index
    %c0_13 = arith.constant 0 : index
    %69 = vector.load %arg6[%c16, %c0_13] : memref<144x128xbf16, #tpu.memory_space<vmem>>, vector<1x32xbf16>
    %cst_14 = arith.constant dense<0xFF800000> : vector<2x32xf32>
    %70 = vector.multi_reduction <maximumf>, %68, %cst_14 [1] : vector<2x8x32xf32> to vector<2x32xf32>
    %71 = arith.extf %69 : vector<1x32xbf16> to vector<1x32xf32>
    %72 = vector.broadcast %71 : vector<1x32xf32> to vector<2x32xf32>
    %73 = arith.addf %70, %72 : vector<2x32xf32>
    %74 = math.tanh %73 : vector<2x32xf32>
    %75 = vector.extract_strided_slice %40 {offsets = [0, 0], sizes = [16, 128], strides = [1, 1]} : vector<16x256xf32> to vector<16x128xf32>
    %76 = math.tanh %75 : vector<16x128xf32>
    %c0_15 = arith.constant 0 : index
    %c0_16 = arith.constant 0 : index
    %77 = vector.load %arg6[%c0_15, %c0_16] : memref<144x128xbf16, #tpu.memory_space<vmem>>, vector<8x128xbf16>
    %78 = arith.truncf %76 : vector<16x128xf32> to vector<16x128xbf16>
    %cst_17 = arith.constant dense<0.000000e+00> : vector<16x8xf32>
    %79 = tpu.matmul %78, %77, %cst_17 {dimension_numbers = #tpu.dot_dimension_numbers<[1], [1], [0], [0], [0, 0, 1, 0], [], []>} : vector<16x128xbf16>, vector<8x128xbf16>, vector<16x8xf32> -> vector<16x8xf32>
    %80 = vector.shape_cast %79 : vector<16x8xf32> to vector<2x8x8xf32>
    %cst_18 = arith.constant 1.000000e+00 : f32
    %81 = vector.broadcast %cst_18 : f32 to vector<2x8x1xf32>
    %82 = arith.subf %0, %81 : vector<2x8x1xf32>
    %cst_19 = arith.constant 1.000000e+30 : f32
    %83 = vector.broadcast %cst_19 : f32 to vector<2x8x1xf32>
    %84 = arith.mulf %82, %83 : vector<2x8x1xf32>
    %85 = vector.broadcast %84 : vector<2x8x1xf32> to vector<2x8x8xf32>
    %86 = arith.addf %80, %85 : vector<2x8x8xf32>
    %cst_20 = arith.constant dense<0xFF800000> : vector<2x8xf32>
    %87 = vector.multi_reduction <maximumf>, %86, %cst_20 [1] : vector<2x8x8xf32> to vector<2x8xf32>
    %88 = vector.shape_cast %87 : vector<2x8xf32> to vector<2x1x8xf32>
    %89 = vector.broadcast %88 : vector<2x1x8xf32> to vector<2x8x8xf32>
    %90 = arith.subf %86, %89 : vector<2x8x8xf32>
    %91 = math.exp %90 : vector<2x8x8xf32>
    %cst_21 = arith.constant dense<0.000000e+00> : vector<2x8xf32>
    %92 = vector.multi_reduction <add>, %91, %cst_21 [1] : vector<2x8x8xf32> to vector<2x8xf32>
    %93 = vector.shape_cast %92 : vector<2x8xf32> to vector<2x1x8xf32>
    %94 = tpu.reciprocal %93 {approx = true} : vector<2x1x8xf32> -> vector<2x1x8xf32>
    %95 = vector.broadcast %94 : vector<2x1x8xf32> to vector<2x8x8xf32>
    %96 = arith.mulf %91, %95 : vector<2x8x8xf32>
    %97 = vector.extract_strided_slice %96 {offsets = [0, 0, 0], sizes = [2, 8, 1], strides = [1, 1, 1]} : vector<2x8x8xf32> to vector<2x8x1xf32>
    %98 = vector.broadcast %97 : vector<2x8x1xf32> to vector<2x8x32xf32>
    %99 = arith.mulf %98, %42 : vector<2x8x32xf32>
    %cst_22 = arith.constant dense<0.000000e+00> : vector<2x32xf32>
    %100 = vector.multi_reduction <add>, %99, %cst_22 [1] : vector<2x8x32xf32> to vector<2x32xf32>
    %101 = vector.extract_strided_slice %96 {offsets = [0, 0, 1], sizes = [2, 8, 1], strides = [1, 1, 1]} : vector<2x8x8xf32> to vector<2x8x1xf32>
    %102 = vector.broadcast %101 : vector<2x8x1xf32> to vector<2x8x32xf32>
    %103 = arith.mulf %102, %42 : vector<2x8x32xf32>
    %cst_23 = arith.constant dense<0.000000e+00> : vector<2x32xf32>
    %104 = vector.multi_reduction <add>, %103, %cst_23 [1] : vector<2x8x32xf32> to vector<2x32xf32>
    %105 = tpu.concatenate %74, %100, %104 in 1 : vector<2x32xf32>, vector<2x32xf32>, vector<2x32xf32> -> vector<2x96xf32>
    %106 = arith.truncf %105 : vector<2x96xf32> to vector<2x96xbf16>
    %c32 = arith.constant 32 : index
    %c0_24 = arith.constant 0 : index
    %107 = vector.load %arg6[%c32, %c0_24] : memref<144x128xbf16, #tpu.memory_space<vmem>>, vector<96x128xbf16>
    %c128 = arith.constant 128 : index
    %c0_25 = arith.constant 0 : index
    %108 = vector.load %arg6[%c128, %c0_25] : memref<144x128xbf16, #tpu.memory_space<vmem>>, vector<1x128xbf16>
    %cst_26 = arith.constant dense<0.000000e+00> : vector<2x128xf32>
    %109 = tpu.matmul %106, %107, %cst_26 {dimension_numbers = #tpu.dot_dimension_numbers<[1], [0], [0], [1], [0, 0, 1, 1], [], []>} : vector<2x96xbf16>, vector<96x128xbf16>, vector<2x128xf32> -> vector<2x128xf32>
    %110 = arith.extf %108 : vector<1x128xbf16> to vector<1x128xf32>
    %111 = vector.broadcast %110 : vector<1x128xf32> to vector<2x128xf32>
    %112 = arith.addf %109, %111 : vector<2x128xf32>
    %c0_27 = arith.constant 0 : index
    %c0_28 = arith.constant 0 : index
    %113 = vector.load %arg7[%c0_27, %c0_28] : memref<2x128xf32, #tpu.memory_space<vmem>>, vector<2x128xf32>
    tpu.vector_store %arg7[%c0_27, %c0_28], %112 {strides = array<i32>} : memref<2x128xf32, #tpu.memory_space<vmem>>, vector<2x128xf32>,
    return
  }
}

</mosaic_0001>

<bundles_post_ra>
// kernel: ea_forward_pallas.1
= control target key start
LH: loop header
LB: loop body
LE: loop exit
PB: predicated region body
PF: predicated region fallthrough
CT: control target
= control target key end

     0   :  { %12 = vsyncpa [#allocation3], 0  ;;  %s1183_s0 = inlined_call_operand.vmem [shape: s32[2,8], index: 0, kind: input, shape index: {}]   ;;  %s1184_s1 = inlined_call_operand.vmem [shape: s32[2,8], index: 1, kind: input, shape index: {}]   ;;  %s1185_s2 = inlined_call_operand.vmem [shape: s32[2,8], index: 2, kind: input, shape index: {}]   ;;  %s1186_s3 = inlined_call_operand.vmem [shape: s32[2,2], index: 3, kind: input, shape index: {}]   ;;  %s1187_s4 = inlined_call_operand.vmem [shape: f32[2,8,1], index: 4, kind: input, shape index: {}]   ;;  %s1188_s5 = inlined_call_operand.hbm [shape: bf16[192,256], index: 5, kind: input, shape index: {}]   ;;  %s1189_s6 = inlined_call_operand.hbm [shape: bf16[144,128], index: 6, kind: input, shape index: {}]   ;;  %s1190_s7 = inlined_call_operand.hbm [shape: f32[2,128], index: 7, kind: output, shape index: {}]  }
   0x1   :  { %13 = vsyncpa [#allocation6], 0 }
   0x2   :  { %14 = vsyncpa [#allocation4], 0  ;;  %s980_s24 = smov [#allocation2]   ;;  %s908_s28 = scalar_lea.hbm %s1188_s5, 3072 }
   0x3   :  { %s30_s25 = sshll.u32 %s980_s24, 4  ;;  %p909_p0 = scmp.ne.s32.totalorder %s1188_s5, %s908_s28  ;;  %s31_s25 = int_to_ptr.vmem [resolvable:$true] %s30_s25 }
   0x4   :  { %p912_p1 = scmp.lt.u32.totalorder %s908_s28, %s1188_s5 }
   0x6   :  { %p914_p2 = pnand %p912_p1, %p909_p0 }
   0x8   :  { %917 = shalt.err (!%p914_p2)
}
   0x9   :  { %s918_s10 = scalar_lea.vmem %s31_s25, 3072  ;;  %p923_p4 = scmp.lt.s32.totalorder %s31_s25, %s31_s25 }
   0xa   :  { %p919_p3 = scmp.ne.s32.totalorder %s31_s25, %s918_s10  ;;  %p924_p5 = scmp.lt.s32.totalorder %s918_s10, %s918_s10 }
   0xc   :  { %p925_p6 = por %p924_p5, %p923_p4 }
   0xe   :  { %p926_p7 = pnand %p925_p6, %p919_p3 }
  0x10   :  { %929 = shalt.err (!%p926_p7)
}
  0x11   :  { %s981_s11 = smov 128   ;;  %s982_s12 = smov 8  }
  0x12   :  { %36 = dma.hbm_to_vmem [thread:$0]  %s1188_s5, 3072, %s31_s25, [#allocation3], %s981_s11, %s981_s11, %s982_s12  }
  0x13   :  { %s983_s15 = smov [#allocation5]   ;;  %s930_s19 = scalar_lea.hbm %s1189_s6, 1152 }
  0x14   :  { %s42_s16 = sshll.u32 %s983_s15, 4  ;;  %p931_p8 = scmp.ne.s32.totalorder %s1189_s6, %s930_s19  ;;  %s43_s16 = int_to_ptr.vmem [resolvable:$true] %s42_s16 }
  0x15   :  { %p934_p9 = scmp.lt.u32.totalorder %s930_s19, %s1189_s6 }
  0x17   :  { %p936_p10 = pnand %p934_p9, %p931_p8 }
  0x19   :  { %939 = shalt.err (!%p936_p10)
}
  0x1a   :  { %s940_s24 = scalar_lea.vmem %s43_s16, 1152  ;;  %p945_p12 = scmp.lt.s32.totalorder %s43_s16, %s43_s16 }
  0x1b   :  { %p941_p11 = scmp.ne.s32.totalorder %s43_s16, %s940_s24  ;;  %p946_p13 = scmp.lt.s32.totalorder %s940_s24, %s940_s24 }
  0x1d   :  { %p947_p0 = por %p946_p13, %p945_p12 }
  0x1f   :  { %p948_p1 = pnand %p947_p0, %p941_p11 }
  0x21   :  { %951 = shalt.err (!%p948_p1)
}
  0x22   :  { %s984_s5 = smov 64   ;;  %s985_s25 = smov 4  }
  0x23   :  { %48 = dma.hbm_to_vmem [thread:$0]  %s1189_s6, 1152, %s43_s16, [#allocation6], %s984_s5, %s984_s5, %s985_s25  }
  0x24   :  { %974 = dma.done.wait [#allocation3], 3072  }
  0x25   :  { %975 = vsyncadd [#allocation3], 4294964224 }
  0x26   :  { %976 = dma.done.wait [#allocation6], 1152  }
  0x27   :  { %977 = vsyncadd [#allocation6], 4294966144  ;;  %v58_v0 = vlaneseq  ;;  %v986_v1 = vmov 1   ;;  %v987_v2 = vmov 0   ;;  %v988_v3 = vmov 1966171168  }
  0x28   :  { %846 = vset.pattern.permute.xlu1 %v986_v1  ;;  %845 = vset.pattern.permute.xlu0 %v987_v2  ;;  %v120_v4 = vunpack.c.l.s4 %v988_v3  ;;  %v76_v10 = vld [vmem:[%s1184_s1] sm:$0x3]  ;;  %v850_v20 = vld [vmem:[#allocation2 + $0x4] ss:$8 sps:$4 sm:$0xff]   ;;  %v853_v25 = vld [vmem:[#allocation2 + $0x14] ss:$8 sps:$4 sm:$0xff]  }
  0x29   :  { %v1062_v5 = vshrl.u32 %v58_v0, 7  ;;  %v760_v11 = vld.sshfl [vmem:[%s1186_s3] sm:$0x11 pattern:$0x75316420]  ;;  %359 = vmatprep.subr.bf16.mxu0 %v850_v20  ;;  %v57_v36 = vld [vmem:[%s1187_s4 + $0x8] sm:$0xff] }
  0x2a   :  { %v121_v6 = vunpack.c.0.s8 %v120_v4  ;;  %v118_v15 = vcombine.high %v760_v11, %v760_v11  ;;  %v93_v19 = vld [vmem:[%s1185_s2] sm:$0x3]  ;;  %v855_v30 = vld [vmem:[#allocation2 + $0x10] ss:$8 sps:$4 sm:$0xff]   ;;  %v856_v31 = vld [vmem:[#allocation2 + $0x24] ss:$8 sps:$4 sm:$0xff]  }
  0x2b   :  { %v1065_v7 = vsub.s32 0, %v1062_v5  ;;  %v71_v8 = vsub.s32 1, %v1062_v5  ;;  %v852_v21 = vld [vmem:[#allocation2] ss:$8 sps:$4 sm:$0xff]   ;;  %v793_v38 = vadd.f32 -1.0, %v57_v36  ;;  %v989_v55 = vmov 0.0  }
  0x2c   :  { %v124_v9 = vsub.s32 %v121_v6, %v1062_v5  ;;  %v56_v29 = vld [vmem:[%s1187_s4] sm:$0xff]  ;;  %360 = vmatpush1.bf16.msra.mxu0 %v852_v21  ;;  %v859_v39 = vld [vmem:[#allocation2 + $0x34] ss:$8 sps:$4 sm:$0xff]   ;;  %v861_v43 = vld [vmem:[#allocation2 + $0x30] ss:$8 sps:$4 sm:$0xff]   ;;  %810 = vmatprep.subr.bf16.mxu1 %v989_v55  ;;  %s992_s4 = smov [#allocation7]  }
  0x2d   :  { %v87_v12 = vrot.slane %v76_v10, %v71_v8  ;;  %v80_v13 = vrot.slane %v76_v10, %v1065_v7  ;;  %v104_v26 = vrot.slane %v93_v19, %v71_v8  ;;  %361 = vmatprep.subr.bf16.mxu0 %v853_v25  ;;  %v97_v33 = vrot.slane %v93_v19, %v1065_v7  ;;  %v61_v34 = vld [vmem:[%s1183_s0] sm:$0x3]  ;;  %v862_v44 = vld [vmem:[#allocation2 + $0x44] ss:$8 sps:$4 sm:$0xff]   ;;  %v865_v47 = vld [vmem:[#allocation2 + $0x54] ss:$8 sps:$4 sm:$0xff]  }
  0x2e   :  { %v125_v14 = vrot.slane %v760_v11, %v124_v9  ;;  %v132_v18 = vrot.slane %v118_v15, %v124_v9  ;;  %v792_v35 = vadd.f32 -1.0, %v56_v29  ;;  %v858_v37 = vld [vmem:[#allocation2 + $0x20] ss:$8 sps:$4 sm:$0xff]   ;;  %v65_v40 = vrot.slane %v61_v34, %v1065_v7  ;;  %v867_v48 = vld [vmem:[#allocation2 + $0x50] ss:$8 sps:$4 sm:$0xff]   ;;  %s991_s0 = smov 96  }
  0x2f   :  { %89 = vbcast.lane.b32.xlu1 %v87_v12, 256  ;;  %82 = vbcast.lane.b32.xlu0 %v80_v13, 256  ;;  %v72_v42 = vrot.slane %v61_v34, %v71_v8  ;;  %v521_v45 = vmul.f32 1e+30, %v793_v38  ;;  %v864_v46 = vld [vmem:[#allocation2 + $0x40] ss:$8 sps:$4 sm:$0xff]  }
  0x30   :  { %v135_v16 = vadd.s32 140, %v125_v14  ;;  %v133_v17 = vadd.s32 90, %v125_v14  ;;  %v134_v24 = vadd.s32 90, %v132_v18  ;;  %v136_v28 = vadd.s32 140, %v132_v18  ;;  %362 = vmatpush1.bf16.msra.mxu0 %v855_v30  ;;  %v868_v49 = vld [vmem:[#allocation2 + $0x64] ss:$8 sps:$4 sm:$0xff]  }
  0x31   :  { %363 = vmatprep.subr.bf16.mxu0 %v856_v31  ;;  %v520_v41 = vmul.f32 1e+30, %v792_v35  ;;  %v870_v50 = vld [vmem:[#allocation2 + $0x60] ss:$8 sps:$4 sm:$0xff]   ;;  %v871_v51 = vld [vmem:[#allocation2 + $0x74] ss:$8 sps:$4 sm:$0xff]  }
  0x32   :  { %v182_v22 = vrot.slane %v135_v16, %v1065_v7  ;;  %v160_v23 = vrot.slane %v133_v17, %v1065_v7  ;;  %v164_v27 = vrot.slane %v134_v24, %v1065_v7  ;;  %v186_v32 = vrot.slane %v136_v28, %v1065_v7  ;;  %v873_v52 = vld [vmem:[#allocation2 + $0x70] ss:$8 sps:$4 sm:$0xff]   ;;  %v874_v53 = vld [vmem:[#allocation2 + $0x84] ss:$8 sps:$4 sm:$0xff]   ;;  %v876_v54 = vld [vmem:[#allocation2 + $0x80] ss:$8 sps:$4 sm:$0xff]  }
  0x33   :  { %v877_v56 = vld [vmem:[#allocation2 + $0x94] ss:$8 sps:$4 sm:$0xff]   ;;  %v879_v57 = vld [vmem:[#allocation2 + $0x90] ss:$8 sps:$4 sm:$0xff]   ;;  %v880_v58 = vld [vmem:[#allocation2 + $0xa4] ss:$8 sps:$4 sm:$0xff]  }
  0x34   :  { %188 = vperm.xlu1 %846, %v182_v22   ;;  %166 = vperm.xlu0 %845, %v160_v23   ;;  %v882_v59 = vld [vmem:[#allocation2 + $0xa0] ss:$8 sps:$4 sm:$0xff]   ;;  %v883_v60 = vld [vmem:[#allocation2 + $0xb4] ss:$8 sps:$4 sm:$0xff]   ;;  %v885_v61 = vld [vmem:[#allocation2 + $0xb0] ss:$8 sps:$4 sm:$0xff]  }
  0x35   :  { %364 = vmatpush1.bf16.msra.mxu0 %v858_v37  ;;  %v59_v8 = vand.u32 127, %v58_v0  ;;  %v1191_v0 = vmov 0  ;;  %v1193_v18 = vmov 0  ;;  %v475_v25 = vld [vmem:[#allocation5] sm:$0xf]  ;;  %s750_s13 = sshll.u32 %s992_s4, 4  ;;  %s751_s13 = int_to_ptr.vmem [resolvable:$true] %s750_s13 }
  0x36   :  { %365 = vmatprep.subr.bf16.mxu0 %v859_v39  ;;  %811 = vmatpush3.bf16.xpose.msra.mxu1 %v475_v25  ;;  %v889_v25 = vld [vmem:[#allocation5 + $0x28] sm:$0xff]   ;;  %s952_s14 = scalar_lea.vmem %s751_s13, 32  ;;  %p957_p3 = scmp.lt.s32.totalorder %s751_s13, %s751_s13 }
  0x37   :  { %v60_v12 = vadd.s32 128, %v59_v8  ;;  %816 = vmatprep.subr.bf16.mxu1 %v989_v55  ;;  %p953_p2 = scmp.ne.s32.totalorder %s751_s13, %s952_s14  ;;  %p958_p4 = scmp.lt.s32.totalorder %s952_s14, %s952_s14 }
  0x38   :  { %106 = vbcast.lane.b32.xlu1 %v104_v26, 256  ;;  %169 = vperm.xlu0 %845, %v164_v27  }
  0x39   :  { %366 = vmatpush1.bf16.msra.mxu0 %v861_v43  ;;  %p959_p5 = por %p958_p4, %p957_p3 }
  0x3a   :  { %367 = vmatprep.subr.bf16.mxu0 %v862_v44 }
  0x3b   :  { %p960_p6 = pnand %p959_p5, %p953_p2 }
  0x3c   :  { %191 = vperm.xlu1 %846, %v186_v32   ;;  %99 = vbcast.lane.b32.xlu0 %v97_v33, 256 }
  0x3d   :  { %368 = vmatpush1.bf16.msra.mxu0 %v864_v46 }
  0x3e   :  { %369 = vmatprep.subr.bf16.mxu0 %v865_v47 }
  0x40   :  { %67 = vbcast.lane.b32.xlu0 %v65_v40, 256  ;;  %74 = vbcast.lane.b32.xlu1 %v72_v42, 256 }
  0x41   :  { %847 = vset.pattern.permute.xlu1 %v987_v2  ;;  %370 = vmatpush1.bf16.msra.mxu0 %v867_v48 }
  0x42   :  { %371 = vmatprep.subr.bf16.mxu0 %v868_v49 }
  0x44   :  { %524 = vperm.xlu0 %845, %v520_v41   ;;  %529 = vperm.xlu1 %847, %v521_v45  }
  0x45   :  { %372 = vmatpush1.bf16.msra.mxu0 %v870_v50 }
  0x46   :  { %373 = vmatprep.subr.bf16.mxu0 %v871_v51 }
  0x48   :  { %409 = vperm.xlu0 %845, %v57_v36   ;;  %404 = vperm.xlu1 %847, %v56_v29  }
  0x49   :  { %374 = vmatpush1.bf16.msra.mxu0 %v873_v52 }
  0x4a   :  { %375 = vmatprep.subr.bf16.mxu0 %v874_v53 }
  0x4d   :  { %376 = vmatpush1.bf16.msra.mxu0 %v876_v54 }
  0x4e   :  { %377 = vmatprep.subr.bf16.mxu0 %v877_v56 }
  0x51   :  { %378 = vmatpush1.bf16.msra.mxu0 %v879_v57 }
  0x52   :  { %379 = vmatprep.subr.bf16.mxu0 %v880_v58 }
  0x55   :  { %380 = vmatpush1.bf16.msra.mxu0 %v882_v59 }
  0x56   :  { %381 = vmatprep.subr.bf16.mxu0 %v883_v60 }
  0x59   :  { %382 = vmatpush1.bf16.msra.mxu0 %v885_v61 }
  0xa1   :  { %v90_v62 = vpop.permute.xlu1 %89  ;;  %v83_v63 = vpop.permute.xlu0 %82 }
  0xa2   :  { %v92_v11 = vadd.s32 50, %v90_v62  ;;  %v91_v16 = vadd.s32 50, %v83_v63 }
  0xa4   :  { %vm143_vm0 = vcmp.eq.s32.totalorder %v59_v8, %v92_v11  ;;  %vm144_vm3 = vcmp.eq.s32.totalorder %v60_v12, %v92_v11  ;;  %vm141_vm15 = vcmp.eq.s32.totalorder %v59_v8, %v91_v16 }
  0xb3   :  { %v189_v2 = vpop.permute.xlu1 %188  ;;  %v167_v3 = vpop.permute.xlu0 %166 }
  0xb7   :  { %v107_v4 = vpop.permute.xlu1 %106  ;;  %v170_v6 = vpop.permute.xlu0 %169 }
  0xb8   :  { %v109_v13 = vadd.s32 70, %v107_v4  ;;  %vm173_vm9 = vcmp.eq.s32.totalorder %v59_v8, %v170_v6 }
  0xba   :  { %vm151_vm5 = vcmp.eq.s32.totalorder %v59_v8, %v109_v13  ;;  %vm152_vm7 = vcmp.eq.s32.totalorder %v60_v12, %v109_v13 }
  0xbb   :  { %v192_v9 = vpop.permute.xlu1 %191  ;;  %v100_v10 = vpop.permute.xlu0 %99 }
  0xbc   :  { %v108_v17 = vadd.s32 70, %v100_v10  ;;  %vm195_vm12 = vcmp.eq.s32.totalorder %v59_v8, %v192_v9 }
  0xbf   :  { %v75_v14 = vpop.permute.xlu1 %74  ;;  %v68_v15 = vpop.permute.xlu0 %67 }
  0xc0   :  { %vm139_vm1 = vcmp.eq.s32.totalorder %v59_v8, %v75_v14  ;;  %vm140_vm2 = vcmp.eq.s32.totalorder %v60_v12, %v75_v14  ;;  %vm137_vm11 = vcmp.eq.s32.totalorder %v59_v8, %v68_v15  ;;  %vm138_vm14 = vcmp.eq.s32.totalorder %v60_v12, %v68_v15 }
  0xc1   :  { %vm147_vm4 = vmor %vm139_vm1, %vm143_vm0  ;;  %vm142_vm1 = vcmp.eq.s32.totalorder %v60_v12, %v91_v16 }
  0xc2   :  { %vm148_vm6 = vmor %vm140_vm2, %vm144_vm3  ;;  %vm149_vm3 = vcmp.eq.s32.totalorder %v59_v8, %v108_v17 }
  0xc3   :  { %vm155_vm8 = vmor %vm147_vm4, %vm151_vm5  ;;  %vm150_vm5 = vcmp.eq.s32.totalorder %v60_v12, %v108_v17  ;;  %v525_v33 = vpop.permute.xlu0 %524  ;;  %v530_v37 = vpop.permute.xlu1 %529 }
  0xc4   :  { %vm1097_vm10 = vmor %vm148_vm6, %vm152_vm7  ;;  %vm171_vm7 = vcmp.eq.s32.totalorder %v59_v8, %v167_v3 }
  0xc5   :  { %v1192_v0 = vsel %vm1097_vm10, 4294967295, %v1191_v0  ;;  %vm177_vm13 = vmor %vm155_vm8, %vm173_vm9  ;;  %vm193_vm8 = vcmp.eq.s32.totalorder %v59_v8, %v189_v2 }
  0xc6   :  { %vm1101_vm0 = vmor %vm177_vm13, %vm195_vm12  ;;  %vm172_vm12 = vcmp.eq.s32.totalorder %v60_v12, %v167_v3 }
  0xc7   :  { %v1194_v18 = vsel %vm1101_vm0, 4294967295, %v1193_v18  ;;  %vm145_vm2 = vmor %vm137_vm11, %vm141_vm15  ;;  %vm174_vm0 = vcmp.eq.s32.totalorder %v60_v12, %v170_v6  ;;  %vm194_vm15 = vcmp.eq.s32.totalorder %v60_v12, %v189_v2 }
  0xc8   :  { %vm146_vm4 = vmor %vm138_vm14, %vm142_vm1  ;;  %vm1195_vm1 = vnez %v1192_v0 }
  0xc9   :  { %vm153_vm6 = vmor %vm145_vm2, %vm149_vm3  ;;  %vm1196_vm2 = vnez %v1194_v18  ;;  %vm196_vm3 = vcmp.eq.s32.totalorder %v60_v12, %v192_v9 }
  0xca   :  { %vm154_vm10 = vmor %vm146_vm4, %vm150_vm5  ;;  %v763_v20 = vsel %vm1196_vm2, 1.0, %v989_v55 }
  0xcb   :  { %vm175_vm9 = vmor %vm153_vm6, %vm171_vm7  ;;  %vm355_vm6 = vcmask 523264   ;;  %vm585_vm7 = vcmask 1048320  }
  0xcc   :  { %vm197_vm13 = vmor %vm175_vm9, %vm193_vm8  ;;  %vm627_vm8 = vcmask 1041409   ;;  %vm419_vm9 = vcmp.le.s32.totalorder %v1062_v5, 6 }
  0xcd   :  { %vm176_vm11 = vmor %vm154_vm10, %vm172_vm12  ;;  %v761_v19 = vsel %vm197_vm13, 1.0, %v989_v55  ;;  %vm990_vm10 = vmmov 0   ;;  %vm416_vm12 = vcmp.ge.s32.totalorder %v1062_v5, 1  ;;  %vm449_vm13 = vcmask 261120  }
  0xce   :  { %vm178_vm14 = vmor %vm1195_vm1, %vm174_vm0  ;;  %v209_v23 = vpack.c.bf16 %v763_v20, %v761_v19  ;;  %812 = vmatprep.mubr.msk.bf16.mxu1 %vm990_vm10, %v989_v55  ;;  %vm534_vm0 = vcmask 64512   ;;  %v410_v19 = vpop.permute.xlu0 %409 }
  0xcf   :  { %vm198_vm4 = vmor %vm176_vm11, %vm194_vm15  ;;  %vm699_vm11 = vcmask 785408  }
  0xd0   :  { %vm200_vm5 = vmor %vm178_vm14, %vm196_vm3  ;;  %v762_v21 = vsel %vm198_vm4, 1.0, %v989_v55 }
  0xd1   :  { %v764_v22 = vsel %vm200_vm5, 1.0, %v989_v55 }
  0xd2   :  { %v210_v24 = vpack.c.bf16 %v764_v22, %v762_v21  ;;  %v405_v21 = vpop.permute.xlu1 %404 }
  0xd4   :  { %789 = vmatprep.mubr.msk.bf16.mxu0 %vm355_vm6, %v210_v24  ;;  %v888_v24 = vld [vmem:[#allocation5 + $0x20] sm:$0xff]  }
  0xd5   :  { %392 = vmatmul.mubr.bf16.vlgmr.msra.gmra.mrb[0].mxu0 %v209_v23  ;;  %v887_v23 = vld [vmem:[#allocation5 + $0x18] sm:$0xff]  }
 0x1a8   :  { %v393_v26 = vpop.f32.mrb[0].mxu0 }
 0x1a9   :  { %v1116_v27 = vpop.f32.mrb[1].mxu0  ;;  %892 = vtanh.f32 %v393_v26 }
 0x1aa   :  { %v397_v28 = vpop.f32.mrb[2].mxu0  ;;  %v1133_v22 = vmul.f32 %v405_v21, %v1116_v27 }
 0x1ab   :  { %894 = vtanh.f32 %v397_v28  ;;  %v1118_v29 = vpop.f32.mrb[3].mxu0 }
 0x1ac   :  { %v1128_v20 = vmul.f32 %v410_v19, %v1118_v29 }
 0x1b3   :  { %v893_v30 = vpop.eup %892 }
 0x1b5   :  { %v895_v31 = vpop.eup %894 }
 0x1b6   :  { %v476_v32 = vpack.c.bf16 %v895_v31, %v893_v30 }
 0x1b8   :  { %813 = vmatmul.mubr.bf16.vlgmr.msra.gmra.mrb[0].mxu1 %v476_v32 }
 0x1b9   :  { %828 = vmatprep.mubr.msk.bf16.mxu1 %vm990_vm10, %v989_v55 }
 0x28b   :  { %v511_v34 = vpop.f32.mrb[0].mxu1 }
 0x28c   :  { %v532_v35 = vadd.f32 %v525_v33, %v511_v34  ;;  %v814_v36 = vpop.f32.mrb[1].mxu1 }
 0x28d   :  { %v514_v38 = vpop.f32.mrb[2].mxu1  ;;  %v890_v36 = vld [vmem:[#allocation5 + $0x30] sm:$0xff]  }
 0x28e   :  { %v535_v39 = vsel %vm534_vm0, %v532_v35, -inf  ;;  %v533_v40 = vadd.f32 %v530_v37, %v514_v38  ;;  %v815_v41 = vpop.f32.mrb[3].mxu1 }
 0x28f   :  { %v536_v42 = vrot.slane %v535_v39, 4 }
 0x290   :  { %v542_v43 = vsel %vm534_vm0, %v533_v40, -inf }
 0x291   :  { %v537_v44 = vmax.f32 %v535_v39, %v536_v42  ;;  %v543_v45 = vrot.slane %v542_v43, 4 }
 0x293   :  { %v538_v46 = vrot.slane %v537_v44, 2  ;;  %v544_v47 = vmax.f32 %v542_v43, %v543_v45 }
 0x295   :  { %v539_v48 = vmax.f32 %v537_v44, %v538_v46  ;;  %v545_v49 = vrot.slane %v544_v47, 2  ;;  %v891_v46 = vld [vmem:[#allocation5 + $0x38] sm:$0xff]  }
 0x297   :  { %v540_v50 = vrot.slane %v539_v48, 1  ;;  %v546_v51 = vmax.f32 %v544_v47, %v545_v49 }
 0x299   :  { %v541_v52 = vmax.f32 %v539_v48, %v540_v50  ;;  %v547_v53 = vrot.slane %v546_v51, 1 }
 0x29b   :  { %v549_v54 = vsub.f32 %v532_v35, %v541_v52  ;;  %v548_v56 = vmax.f32 %v546_v51, %v547_v53 }
 0x29d   :  { %v551_v57 = vmul.f32 1.442695, %v549_v54  ;;  %v550_v58 = vsub.f32 %v533_v40, %v548_v56 }
 0x29f   :  { %896 = vpow2.f32 %v551_v57  ;;  %v553_v59 = vmul.f32 1.442695, %v550_v58 }
 0x2a1   :  { %898 = vpow2.f32 %v553_v59 }
 0x2a9   :  { %v897_v60 = vpop.eup %896 }
 0x2aa   :  { %v555_v61 = vsel %vm534_vm0, %v897_v60, 0.0 }
 0x2ab   :  { %v899_v62 = vpop.eup %898  ;;  %v556_v63 = vrot.slane %v555_v61, 4 }
 0x2ac   :  { %v562_v2 = vsel %vm534_vm0, %v899_v62, 0.0 }
 0x2ad   :  { %v557_v3 = vadd.f32 %v556_v63, %v555_v61  ;;  %v563_v4 = vrot.slane %v562_v2, 4 }
 0x2af   :  { %v558_v6 = vrot.slane %v557_v3, 2  ;;  %v564_v8 = vadd.f32 %v563_v4, %v562_v2 }
 0x2b1   :  { %v559_v9 = vadd.f32 %v558_v6, %v557_v3  ;;  %v565_v10 = vrot.slane %v564_v8, 2 }
 0x2b3   :  { %v560_v11 = vrot.slane %v559_v9, 1  ;;  %v566_v12 = vadd.f32 %v565_v10, %v564_v8  ;;  %v423_v10 = vrot.slane %v1128_v20, 7 }
 0x2b5   :  { %v561_v13 = vadd.f32 %v560_v11, %v559_v9  ;;  %v567_v14 = vrot.slane %v566_v12, 1 }
 0x2b7   :  { %900 = vrcp.f32 %v561_v13  ;;  %v568_v15 = vadd.f32 %v567_v14, %v566_v12  ;;  %v791_v12 = vsel %vm419_vm9, 1.0, %v989_v55  ;;  %v422_v13 = vrot.slane %v1133_v22, 7 }
 0x2b9   :  { %902 = vrcp.f32 %v568_v15  ;;  %v790_v15 = vsel %vm416_vm12, 1.0, %v989_v55 }
 0x2ba   :  { %v424_v19 = vmul.f32 %v790_v15, %v422_v13 }
 0x2c1   :  { %v901_v16 = vpop.eup %900 }
 0x2c2   :  { %v571_v17 = vmul.f32 %v901_v16, %v897_v60  ;;  %v425_v16 = vmul.f32 %v790_v15, %v423_v10 }
 0x2c3   :  { %v903_v0 = vpop.eup %902 }
 0x2c4   :  { %575 = vperm.xlu0 %845, %v571_v17   ;;  %v572_v18 = vmul.f32 %v903_v0, %v899_v62 }
 0x2c6   :  { %580 = vperm.xlu1 %847, %v572_v18  }
 0x2c8   :  { %848 = vset.pattern.permute.xlu0 %v986_v1 }
 0x2c9   :  { %601 = vperm.xlu0 %848, %v571_v17  }
 0x2ca   :  { %849 = vset.pattern.permute.xlu1 %v986_v1  ;;  %v886_v1 = vld [vmem:[#allocation5 + $0x10] sm:$0xff]  }
 0x2cb   :  { %605 = vperm.xlu1 %849, %v572_v18   ;;  %817 = vmatpush3.bf16.msra.mxu1 %v886_v1 }
 0x2cc   :  { %818 = vmatprep.subr.bf16.mxu1 %v989_v55 }
 0x2cd   :  { %430 = vrot.lane.b32.xlu0 %v1128_v20, %s991_s0 }
 0x2cf   :  { %438 = vrot.lane.b32.xlu1 %v1128_v20, %s984_s5  ;;  %819 = vmatpush3.bf16.msra.mxu1 %v887_v23 }
 0x2d0   :  { %820 = vmatprep.subr.bf16.mxu1 %v989_v55 }
 0x2d1   :  { %428 = vrot.lane.b32.xlu0 %v1133_v22, %s991_s0 }
 0x2d3   :  { %436 = vrot.lane.b32.xlu1 %v1133_v22, %s984_s5  ;;  %821 = vmatpush3.bf16.msra.mxu1 %v888_v24 }
 0x2d4   :  { %822 = vmatprep.subr.bf16.mxu1 %v989_v55 }
 0x2d7   :  { %823 = vmatpush3.bf16.msra.mxu1 %v889_v25 }
 0x2d8   :  { %824 = vmatprep.subr.bf16.mxu1 %v989_v55 }
 0x2db   :  { %825 = vmatpush3.bf16.msra.mxu1 %v890_v36 }
 0x2dc   :  { %826 = vmatprep.subr.bf16.mxu1 %v989_v55 }
 0x2df   :  { %827 = vmatpush3.bf16.msra.mxu1 %v891_v46 }
 0x343   :  { %v576_v26 = vpop.permute.xlu0 %575 }
 0x344   :  { %v583_v28 = vmul.f32 %v576_v26, %v1116_v27 }
 0x345   :  { %v581_v30 = vpop.permute.xlu1 %580 }
 0x346   :  { %v586_v31 = vsel %vm585_vm7, %v583_v28, 0.0  ;;  %v584_v32 = vmul.f32 %v581_v30, %v1118_v29 }
 0x347   :  { %v587_v33 = vrot.slane %v586_v31, 4 }
 0x348   :  { %v593_v34 = vsel %vm585_vm7, %v584_v32, 0.0  ;;  %v602_v35 = vpop.permute.xlu0 %601  ;;  %v448_v32 = vld [vmem:[#allocation5 + $0x8] sm:$0x1] }
 0x349   :  { %v588_v37 = vadd.f32 %v587_v33, %v586_v31  ;;  %v594_v38 = vrot.slane %v593_v34, 4  ;;  %v608_v39 = vmul.f32 %v602_v35, %v1116_v27 }
 0x34a   :  { %v606_v40 = vpop.permute.xlu1 %605 }
 0x34b   :  { %v589_v41 = vrot.slane %v588_v37, 2  ;;  %v595_v42 = vadd.f32 %v594_v38, %v593_v34  ;;  %v610_v43 = vsel %vm585_vm7, %v608_v39, 0.0  ;;  %v609_v44 = vmul.f32 %v606_v40, %v1118_v29 }
 0x34c   :  { %v611_v45 = vrot.slane %v610_v43, 4  ;;  %v431_v8 = vpop.permute.xlu0 %430  ;;  %v464_v34 = vunpack.c.l.bf16 %v448_v32 }
 0x34d   :  { %v590_v47 = vadd.f32 %v589_v41, %v588_v37  ;;  %v596_v48 = vrot.slane %v595_v42, 2  ;;  %v617_v49 = vsel %vm585_vm7, %v609_v44, 0.0  ;;  %v435_v18 = vadd.f32 %v431_v8, %v425_v16 }
 0x34e   :  { %v612_v50 = vadd.f32 %v611_v45, %v610_v43  ;;  %v618_v51 = vrot.slane %v617_v49, 4  ;;  %v439_v6 = vpop.permute.xlu1 %438  ;;  %v468_v37 = vrot.slane %v464_v34, %v1065_v7 }
 0x34f   :  { %v597_v27 = vadd.f32 %v596_v48, %v595_v42  ;;  %v591_v52 = vrot.slane %v590_v47, 1  ;;  %v443_v11 = vrot.slane %v439_v6, 1 }
 0x350   :  { %v613_v53 = vrot.slane %v612_v50, 2  ;;  %v619_v54 = vadd.f32 %v618_v51, %v617_v49  ;;  %v429_v0 = vpop.permute.xlu0 %428  ;;  %v657_v51 = vld [vmem:[#allocation5 + $0x40] sm:$0x1] }
 0x351   :  { %v598_v56 = vrot.slane %v597_v27, 1  ;;  %v592_v29 = vadd.f32 %v591_v52, %v590_v47  ;;  %v445_v17 = vmul.f32 %v791_v12, %v443_v11  ;;  %v434_v23 = vadd.f32 %v429_v0, %v424_v19 }
 0x352   :  { %v614_v57 = vadd.f32 %v613_v53, %v612_v50  ;;  %v620_v58 = vrot.slane %v619_v54, 2  ;;  %v437_v9 = vpop.permute.xlu1 %436 }
 0x353   :  { %v599_v59 = vadd.f32 %v598_v56, %v597_v27  ;;  %v442_v14 = vrot.slane %v437_v9, 1  ;;  %v447_v1 = vadd.f32 %v445_v17, %v435_v18  ;;  %v658_v27 = vunpack.c.l.bf16 %v657_v51 }
 0x354   :  { %v615_v60 = vrot.slane %v614_v57, 1  ;;  %v621_v61 = vadd.f32 %v620_v58, %v619_v54 }
 0x355   :  { %v632_v62 = vsel %vm627_vm8, %v599_v59, %v592_v29  ;;  %v444_v21 = vmul.f32 %v791_v12, %v442_v14  ;;  %v457_v20 = vsel %vm449_vm13, %v447_v1, -inf  ;;  %v662_v52 = vrot.slane %v658_v27, %v1065_v7 }
 0x356   :  { %v622_v63 = vrot.slane %v621_v61, 1  ;;  %633 = vrot.lane.b32.xlu1 %v632_v62, %s984_s5  ;;  %v616_v2 = vadd.f32 %v615_v60, %v614_v57  ;;  %v458_v25 = vrot.slane %v457_v20, 4 }
 0x357   :  { %v446_v5 = vadd.f32 %v444_v21, %v434_v23 }
 0x358   :  { %v623_v3 = vadd.f32 %v622_v63, %v621_v61  ;;  %v459_v22 = vmax.f32 %v457_v20, %v458_v25 }
 0x359   :  { %v450_v24 = vsel %vm449_vm13, %v446_v5, -inf }
 0x35a   :  { %v638_v4 = vsel %vm627_vm8, %v623_v3, %v616_v2  ;;  %v451_v26 = vrot.slane %v450_v24, 4  ;;  %v460_v30 = vrot.slane %v459_v22, 2 }
 0x35b   :  { %639 = vrot.lane.b32.xlu0 %v638_v4, %s991_s0 }
 0x35c   :  { %v452_v28 = vmax.f32 %v450_v24, %v451_v26  ;;  %v461_v31 = vmax.f32 %v459_v22, %v460_v30 }
 0x35e   :  { %v453_v55 = vrot.slane %v452_v28, 2  ;;  %v462_v35 = vrot.slane %v461_v31, 1 }
 0x360   :  { %v454_v33 = vmax.f32 %v452_v28, %v453_v55  ;;  %v463_v38 = vmax.f32 %v461_v31, %v462_v35 }
 0x362   :  { %v455_v36 = vrot.slane %v454_v33, 1  ;;  %v470_v40 = vadd.f32 %v468_v37, %v463_v38 }
 0x364   :  { %v456_v39 = vmax.f32 %v454_v33, %v455_v36  ;;  %904 = vtanh.f32 %v470_v40 }
 0x366   :  { %v469_v41 = vadd.f32 %v468_v37, %v456_v39 }
 0x368   :  { %906 = vtanh.f32 %v469_v41 }
 0x36e   :  { %v905_v42 = vpop.eup %904 }
 0x36f   :  { %v626_v45 = vrot.slane %v905_v42, 7 }
 0x372   :  { %v907_v43 = vpop.eup %906 }
 0x373   :  { %v628_v46 = vsel %vm627_vm8, %v626_v45, %v907_v43 }
 0x3c8   :  { %v634_v44 = vpop.permute.xlu1 %633 }
 0x3c9   :  { %v642_v47 = vsel %vm449_vm13, %v628_v46, %v634_v44 }
 0x3cd   :  { %v640_v48 = vpop.permute.xlu0 %639 }
 0x3ce   :  { %v643_v49 = vsel %vm355_vm6, %v642_v47, %v640_v48 }
 0x3cf   :  { %v644_v50 = vpack.c.bf16 %v643_v49, %v643_v49 }
 0x3d1   :  { %829 = vmatmul.mubr.msk.bf16.vlgmr.msra.gmra.mrb[4].mxu1 %vm699_vm11, %v644_v50 }
 0x4a4   :  { %v737_v53 = vpop.f32.mrb[4].mxu1 }
 0x4a5   :  { %v738_v54 = vadd.f32 %v737_v53, %v662_v52  ;;  %v830_v56 = vpop.f32.mrb[5].mxu1 }
 0x4a6   :  { %v740_v57 = vpop.f32.mrb[6].mxu1 }
 0x4a7   :  { %743 = vst [vmem:[#allocation7] sm:$0x3] %v738_v54  ;;  %v831_v58 = vpop.f32.mrb[7].mxu1 }
 0x4a8   :  { %963 = shalt.err (!%p960_p6)
}
 0x4a9   :  { %s964_s17 = scalar_lea.hbm %s1190_s7, 32 }
 0x4aa   :  { %p965_p7 = scmp.ne.s32.totalorder %s1190_s7, %s964_s17  ;;  %p968_p8 = scmp.lt.u32.totalorder %s964_s17, %s1190_s7 }
 0x4ac   :  { %p970_p9 = pnand %p968_p8, %p965_p7 }
 0x4ae   :  { %973 = shalt.err (!%p970_p9)
}
 0x4af   :  { %753 = dma.vmem_to_hbm [thread:$0]  %s751_s13, 32, %s1190_s7, [#allocation4]  }
 0x4b0   :  { %978 = dma.done.wait [#allocation4], 32  }
 0x4b1   :  { %979 = vsyncadd [#allocation4], 4294967264 }
 0x4b2   :  { %757 = vsyncpa [#allocation3], 1 }
 0x4b3   :  { %758 = vsyncpa [#allocation6], 1 }
 0x4b4   :  { %759 = vsyncpa [#allocation4], 1 }

</bundles_post_ra>
